<compile_context>
chip_gen: v5e
topology: v5e:2x2
jax: 0.10.0
libtpu: 0.0.40
codegen_flags: <defaults>
</compile_context>

<pallas_src>
import jax
import jax.numpy as jnp
from jax.experimental import pallas as pl
from jax.experimental.pallas import tpu as pltpu

INPUT_SIZE = 784
HIDDEN_SIZE = 100
OUTPUT_SIZE = 10
LANE = 128
SUBLANE = 8
NEG_BIG = -1e30  # padded-class bias: exp underflows to exactly 0


def _round_up(x, m):
    return ((x + m - 1) // m) * m


def mlp_kernel(x_ref, w1_ref, b1_ref, w2_ref, b2_ref, o_ref):
    # x_ref : (TB, 784) f32    w1_ref: (784, HP) bf16   b1_ref: (1, HP) f32
    # w2_ref: (HP, OP)  bf16   b2_ref: (1, OP)   f32    o_ref : (TB, OP) f32
    x = x_ref[...].astype(jnp.bfloat16)  # in-kernel cast; x stays f32 in HBM

    # Linear 1: bf16 MXU matmul, f32 accumulation, then bias + ReLU in f32.
    h = jnp.dot(x, w1_ref[...], preferred_element_type=jnp.float32) + b1_ref[...]
    h = jnp.maximum(h, 0.0)

    # Linear 2: bf16 MXU matmul over the lane-padded hidden/class dims.
    logits = jnp.dot(h.astype(jnp.bfloat16), w2_ref[...],
                     preferred_element_type=jnp.float32) + b2_ref[...]

    # Stable softmax over the padded class dim; padded classes carry a -1e30
    # bias -> exp == 0 exactly, so they do not perturb max or denominator.
    m = jnp.max(logits, axis=-1, keepdims=True)
    e = jnp.exp(logits - m)
    denom = jnp.sum(e, axis=-1, keepdims=True)
    o_ref[...] = (e / denom).astype(o_ref.dtype)  # exact division: rows sum to 1


def prepare_params(w1, b1, w2, b2):
    """One-time pad/cast of the weights (hoisted out of the per-call path)."""
    in_sz, hid = w1.shape
    out_sz = w2.shape[1]
    hp = _round_up(hid, LANE)   # 100 -> 128
    op = _round_up(out_sz, LANE)  # 10 -> 128 (lane-dense output block)
    w1p = jnp.zeros((in_sz, hp), jnp.float32).at[:, :hid].set(w1).astype(jnp.bfloat16)
    b1p = jnp.zeros((1, hp), jnp.float32).at[:, :hid].set(b1.reshape(1, -1))
    w2p = jnp.zeros((hp, op), jnp.float32).at[:hid, :out_sz].set(w2).astype(jnp.bfloat16)
    b2p = jnp.full((1, op), NEG_BIG, jnp.float32).at[:, :out_sz].set(
        b2.reshape(1, -1).astype(jnp.float32))
    return w1p, b1p, w2p, b2p, out_sz


def paper_model_forward(x_nchw, params, *, batch_tile=2048):
    """x_nchw: (B, C, H, W) float32; returns (B, 10) softmax probabilities."""
    w1p, b1p, w2p, b2p, out_sz = params
    B = x_nchw.shape[0]
    x2d = x_nchw.reshape(B, -1).astype(jnp.float32)  # nn.Flatten (row-major, as torch)
    in_sz, hp = w1p.shape
    op = w2p.shape[1]
    assert x2d.shape[1] == in_sz

    # Batch tile: sublane aligned; ragged last block handled by Pallas (clipped
    # DMA, masked OOB writes; all math is row-wise so garbage rows are inert).
    tb = min(batch_tile, _round_up(B, SUBLANE))
    # v7x megacore: give the ("parallel",) batch axis >= 2 grid steps when large.
    if B > 1024 and pl.cdiv(B, tb) < 2:
        tb = _round_up(pl.cdiv(B, 2), SUBLANE)
    grid = (pl.cdiv(B, tb),)

    cost = pl.CostEstimate(
        flops=2 * B * (in_sz * hp + hp * op),
        transcendentals=B * op,
        bytes_accessed=(B * in_sz * 4          # x (f32, read once in-kernel)
                        + in_sz * hp * 2       # w1 bf16
                        + hp * op * 2          # w2 bf16
                        + hp * 4 + op * 4      # biases
                        + B * op * 4),         # output
    )

    out = pl.pallas_call(
        mlp_kernel,
        out_shape=jax.ShapeDtypeStruct((B, op), jnp.float32),
        grid=grid,
        in_specs=[
            pl.BlockSpec((tb, in_sz), lambda i: (i, 0)),   # x: batch-tiled, double-buffered
            pl.BlockSpec((in_sz, hp), lambda i: (0, 0)),   # w1: VMEM resident
            pl.BlockSpec((1, hp),     lambda i: (0, 0)),   # b1: VMEM resident
            pl.BlockSpec((hp, op),    lambda i: (0, 0)),   # w2: VMEM resident
            pl.BlockSpec((1, op),     lambda i: (0, 0)),   # b2: VMEM resident
        ],
        out_specs=pl.BlockSpec((tb, op), lambda i: (i, 0)),
        compiler_params=pltpu.CompilerParams(
            dimension_semantics=("parallel",),
            vmem_limit_bytes=40 * 1024 * 1024,  # > v5e 16 MiB default, < v7x 64 MiB phys
        ),
        cost_estimate=cost,
    )(x2d, w1p, b1p, w2p, b2p)
    return out[:, :out_sz]


def init_params(key, input_size=INPUT_SIZE, hidden_size=HIDDEN_SIZE,
                output_size=OUTPUT_SIZE):
    """Deterministic init mimicking torch.nn.Linear (uniform +/- 1/sqrt(fan_in))."""
    k1, k2, k3, k4 = jax.random.split(key, 4)
    bound1 = 1.0 / (input_size ** 0.5)
    bound2 = 1.0 / (hidden_size ** 0.5)
    w1 = jax.random.uniform(k1, (input_size, hidden_size), jnp.float32, -bound1, bound1)
    b1 = jax.random.uniform(k2, (hidden_size,), jnp.float32, -bound1, bound1)
    w2 = jax.random.uniform(k3, (hidden_size, output_size), jnp.float32, -bound2, bound2)
    b2 = jax.random.uniform(k4, (output_size,), jnp.float32, -bound2, bound2)
    return w1, b1, w2, b2


def _reference_forward(x_nchw, w1, b1, w2, b2):
    x = x_nchw.reshape(x_nchw.shape[0], -1)
    h = jnp.maximum(x @ w1 + b1, 0.0)
    logits = h @ w2 + b2
    return jax.nn.softmax(logits, axis=-1)


if __name__ == "__main__":
    key = jax.random.PRNGKey(0)
    kx, kp = jax.random.split(key)

    # Small MNIST-like input: batch=2, NCHW = (2, 1, 28, 28) -> 784 features.
    x = jax.random.normal(kx, (2, 1, 28, 28), dtype=jnp.float32)
    w1, b1, w2, b2 = init_params(kp)
    params = prepare_params(w1, b1, w2, b2)   # one-time pad/cast of weights

    out = paper_model_forward(x, params)
    out = jax.block_until_ready(out)

    # Sanity checks: shape, softmax rows sum to 1 (exact division), close to the
    # f32 reference (bf16 matmul operands give ~1e-3..1e-2 deviation).
    assert out.shape == (2, OUTPUT_SIZE)
    assert jnp.allclose(jnp.sum(out, axis=-1), 1.0, atol=1e-4)
    ref = _reference_forward(x, w1, b1, w2, b2)
    assert jnp.max(jnp.abs(out - ref)) < 2e-2

    print("KERNEL_OK")
</pallas_src>

<mosaic_0001>
module attributes {stable_mosaic.version = 11 : i64} {
  func.func @mlp_kernel(%arg0: i32, %arg1: memref<8x784xf32, #tpu.memory_space<vmem>>, %arg2: memref<784x128xbf16, #tpu.memory_space<vmem>>, %arg3: memref<1x128xf32, #tpu.memory_space<vmem>>, %arg4: memref<128x128xbf16, #tpu.memory_space<vmem>>, %arg5: memref<1x128xf32, #tpu.memory_space<vmem>>, %arg6: memref<8x128xf32, #tpu.memory_space<vmem>>) attributes {dimension_semantics = [#tpu.dimension_semantics<parallel>], iteration_bounds = array<i64: 1>, scalar_prefetch = 0 : i64, scratch_operands = 0 : i64, tpu.core_type = #tpu.core_type<tc>, window_params = [{transform_indices = @transform_0, window_bounds = array<i64: 8, 784>}, {pipeline_mode = #tpu.pipeline_mode<synchronous>, transform_indices = @transform_1, window_bounds = array<i64: 784, 128>}, {pipeline_mode = #tpu.pipeline_mode<synchronous>, transform_indices = @transform_2, window_bounds = array<i64: 1, 128>}, {pipeline_mode = #tpu.pipeline_mode<synchronous>, transform_indices = @transform_3, window_bounds = array<i64: 128, 128>}, {pipeline_mode = #tpu.pipeline_mode<synchronous>, transform_indices = @transform_4, window_bounds = array<i64: 1, 128>}, {transform_indices = @transform_5, window_bounds = array<i64: 8, 128>}]} {
    %c0 = arith.constant 0 : index
    %c0_0 = arith.constant 0 : index
    %0 = vector.load %arg1[%c0, %c0_0] : memref<8x784xf32, #tpu.memory_space<vmem>>, vector<8x784xf32>
    %1 = arith.truncf %0 : vector<8x784xf32> to vector<8x784xbf16>
    %c0_1 = arith.constant 0 : index
    %c0_2 = arith.constant 0 : index
    %2 = vector.load %arg2[%c0_1, %c0_2] : memref<784x128xbf16, #tpu.memory_space<vmem>>, vector<784x128xbf16>
    %cst = arith.constant dense<0.000000e+00> : vector<8x128xf32>
    %3 = tpu.matmul %1, %2, %cst {dimension_numbers = #tpu.dot_dimension_numbers<[1], [0], [0], [1], [0, 0, 1, 1], [], []>} : vector<8x784xbf16>, vector<784x128xbf16>, vector<8x128xf32> -> vector<8x128xf32>
    %c0_3 = arith.constant 0 : index
    %c0_4 = arith.constant 0 : index
    %4 = vector.load %arg3[%c0_3, %c0_4] : memref<1x128xf32, #tpu.memory_space<vmem>>, vector<1x128xf32>
    %5 = vector.broadcast %4 : vector<1x128xf32> to vector<8x128xf32>
    %6 = arith.addf %3, %5 : vector<8x128xf32>
    %cst_5 = arith.constant 0.000000e+00 : f32
    %7 = vector.broadcast %cst_5 : f32 to vector<8x128xf32>
    %8 = arith.maximumf %6, %7 : vector<8x128xf32>
    %9 = arith.truncf %8 : vector<8x128xf32> to vector<8x128xbf16>
    %c0_6 = arith.constant 0 : index
    %c0_7 = arith.constant 0 : index
    %10 = vector.load %arg4[%c0_6, %c0_7] : memref<128x128xbf16, #tpu.memory_space<vmem>>, vector<128x128xbf16>
    %cst_8 = arith.constant dense<0.000000e+00> : vector<8x128xf32>
    %11 = tpu.matmul %9, %10, %cst_8 {dimension_numbers = #tpu.dot_dimension_numbers<[1], [0], [0], [1], [0, 0, 1, 1], [], []>} : vector<8x128xbf16>, vector<128x128xbf16>, vector<8x128xf32> -> vector<8x128xf32>
    %c0_9 = arith.constant 0 : index
    %c0_10 = arith.constant 0 : index
    %12 = vector.load %arg5[%c0_9, %c0_10] : memref<1x128xf32, #tpu.memory_space<vmem>>, vector<1x128xf32>
    %13 = vector.broadcast %12 : vector<1x128xf32> to vector<8x128xf32>
    %14 = arith.addf %11, %13 : vector<8x128xf32>
    %cst_11 = arith.constant dense<0xFF800000> : vector<8xf32>
    %15 = vector.multi_reduction <maximumf>, %14, %cst_11 [1] : vector<8x128xf32> to vector<8xf32>
    %16 = vector.shape_cast %15 : vector<8xf32> to vector<8x1xf32>
    %17 = vector.broadcast %16 : vector<8x1xf32> to vector<8x128xf32>
    %18 = arith.subf %14, %17 : vector<8x128xf32>
    %19 = math.exp %18 : vector<8x128xf32>
    %cst_12 = arith.constant dense<0.000000e+00> : vector<8xf32>
    %20 = vector.multi_reduction <add>, %19, %cst_12 [1] : vector<8x128xf32> to vector<8xf32>
    %21 = vector.shape_cast %20 : vector<8xf32> to vector<8x1xf32>
    %22 = vector.broadcast %21 : vector<8x1xf32> to vector<8x128xf32>
    %23 = arith.divf %19, %22 : vector<8x128xf32>
    %c0_13 = arith.constant 0 : index
    %c0_14 = arith.constant 0 : index
    %24 = vector.load %arg6[%c0_13, %c0_14] : memref<8x128xf32, #tpu.memory_space<vmem>>, vector<8x128xf32>
    tpu.vector_store %arg6[%c0_13, %c0_14], %23 {strides = array<i32>} : memref<8x128xf32, #tpu.memory_space<vmem>>, vector<8x128xf32>,
    return
  }
  func.func @transform_0(%arg0: i32) -> (i32, i32) {
    %c0_i32 = arith.constant 0 : i32
    %c0_i32_0 = arith.constant 0 : i32
    return %arg0, %c0_i32 : i32, i32
  }
  func.func @transform_1(%arg0: i32) -> (i32, i32) {
    %c0_i32 = arith.constant 0 : i32
    %c0_i32_0 = arith.constant 0 : i32
    %c0_i32_1 = arith.constant 0 : i32
    return %c0_i32, %c0_i32_0 : i32, i32
  }
  func.func @transform_2(%arg0: i32) -> (i32, i32) {
    %c0_i32 = arith.constant 0 : i32
    %c0_i32_0 = arith.constant 0 : i32
    %c0_i32_1 = arith.constant 0 : i32
    return %c0_i32, %c0_i32_0 : i32, i32
  }
  func.func @transform_3(%arg0: i32) -> (i32, i32) {
    %c0_i32 = arith.constant 0 : i32
    %c0_i32_0 = arith.constant 0 : i32
    %c0_i32_1 = arith.constant 0 : i32
    return %c0_i32, %c0_i32_0 : i32, i32
  }
  func.func @transform_4(%arg0: i32) -> (i32, i32) {
    %c0_i32 = arith.constant 0 : i32
    %c0_i32_0 = arith.constant 0 : i32
    %c0_i32_1 = arith.constant 0 : i32
    return %c0_i32, %c0_i32_0 : i32, i32
  }
  func.func @transform_5(%arg0: i32) -> (i32, i32) {
    %c0_i32 = arith.constant 0 : i32
    %c0_i32_0 = arith.constant 0 : i32
    return %arg0, %c0_i32 : i32, i32
  }
}

</mosaic_0001>

<bundles_post_ra>
// kernel: tpu_custom_call.1
= control target key start
LH: loop header
LB: loop body
LE: loop exit
PB: predicated region body
PF: predicated region fallthrough
CT: control target
= control target key end

     0   :  { %10 = vsyncpa [#allocation3], 0  ;;  %s1200_s0 = inlined_call_operand.hbm [shape: f32[2,784], index: 0, kind: input, shape index: {}]   ;;  %s1201_s1 = inlined_call_operand.hbm [shape: bf16[784,128], index: 1, kind: input, shape index: {}]   ;;  %s1202_s2 = inlined_call_operand.vmem [shape: f32[1,128], index: 2, kind: input, shape index: {}]   ;;  %s1203_s3 = inlined_call_operand.hbm [shape: bf16[128,128], index: 3, kind: input, shape index: {}]   ;;  %s1204_s4 = inlined_call_operand.vmem [shape: f32[1,128], index: 4, kind: input, shape index: {}]   ;;  %s1205_s5 = inlined_call_operand.hbm [shape: f32[2,128], index: 5, kind: output, shape index: {}]  }
   0x1   :  { %11 = vsyncpa [#allocation6], 0 }
   0x2   :  { %12 = vsyncpa [#allocation4], 0  ;;  %s30_s20 = sshll.u32 %s1201_s1, 4  ;;  %s31_s20 = int_to_ptr.hbm [resolvable:$true] %s30_s20 }
   0x3   :  { %16 = vsyncadd [#allocation3], 672  ;;  %s1142_s21 = smov [#allocation5]   ;;  %s17_s25 = sshll.u32 %s1200_s0, 4  ;;  %s18_s25 = int_to_ptr.hbm [resolvable:$true] %s17_s25 }
   0x4   :  { %s32_s22 = sshll.u32 %s1142_s21, 4  ;;  %s1143_s26 = smov 64   ;;  %s33_s22 = int_to_ptr.vmem [resolvable:$true] %s32_s22 }
   0x5   :  { %s1144_s27 = smov 4   ;;  %s1145_s28 = smov [#allocation2]  }
   0x6   :  { %38 = dma.hbm_to_vmem [thread:$0]  %s31_s20, 6272, %s33_s22, [#allocation6], %s1143_s26, %s1143_s26, %s1144_s27  }
   0x7   :  { %s19_s29 = sshll.u32 %s1145_s28, 4  ;;  %s1146_s30 = smov 224   ;;  %s20_s29 = int_to_ptr.vmem [resolvable:$true] %s19_s29 }
   0x8   :  { %s1147_s6 = smov 14   ;;  %s45_s8 = sshll.u32 %s1203_s3, 4  ;;  %s46_s8 = int_to_ptr.hbm [resolvable:$true] %s45_s8 }
   0x9   :  { %25 = dma.hbm_to_vmem [thread:$0]  %s18_s25, 224, %s20_s29, [#allocation3], %s1146_s30, %s1146_s30, %s1147_s6  }
   0xa   :  { %s1148_s9 = smov [#allocation7]  }
   0xb   :  { %s47_s10 = sshll.u32 %s1148_s9, 4  ;;  %s48_s10 = int_to_ptr.vmem [resolvable:$true] %s47_s10 }
   0xc   :  { %53 = dma.hbm_to_vmem [thread:$0]  %s46_s8, 1024, %s48_s10, [#allocation6], %s1143_s26, %s1143_s26, %s1144_s27  }
   0xd   :  { %1136 = dma.done.wait [#allocation3], 896  }
   0xe   :  { %1137 = vsyncadd [#allocation3], 4294966400 }
   0xf   :  { %1138 = dma.done.wait [#allocation6], 7296  }
  0x10   :  { %1139 = vsyncadd [#allocation6], 4294960000  ;;  %v974_v0 = vld [vmem:[#allocation5 + $0x38] sm:$0xff]  ;;  %v973_v3 = vld [vmem:[#allocation5 + $0x30] sm:$0xff]  ;;  %vm517_vm0 = vcmask 130048  }
  0x11   :  { %v982_v1 = vld [vmem:[#allocation5 + $0x78] sm:$0xff]  ;;  %521 = vmatpush.bf16.msra.mxu0 %v974_v0  ;;  %v981_v4 = vld [vmem:[#allocation5 + $0x70] sm:$0xff]  ;;  %v972_v8 = vld [vmem:[#allocation5 + $0x28] sm:$0xff] }
  0x12   :  { %v990_v2 = vld [vmem:[#allocation5 + $0xb8] sm:$0xff]  ;;  %534 = vmatpush.bf16.msra.mxu1 %v982_v1  ;;  %v989_v5 = vld [vmem:[#allocation5 + $0xb0] sm:$0xff]  ;;  %v980_v9 = vld [vmem:[#allocation5 + $0x68] sm:$0xff] }
  0x13   :  { %547 = vmatpush.bf16.msra.mxu2 %v990_v2  ;;  %v998_v6 = vld [vmem:[#allocation5 + $0xf8] sm:$0xff]  ;;  %v997_v7 = vld [vmem:[#allocation5 + $0xf0] sm:$0xff]  ;;  %v988_v10 = vld [vmem:[#allocation5 + $0xa8] sm:$0xff] }
  0x14   :  { %560 = vmatpush.bf16.msra.mxu3 %v998_v6  ;;  %v996_v11 = vld [vmem:[#allocation5 + $0xe8] sm:$0xff]  ;;  %v971_v12 = vld [vmem:[#allocation5 + $0x20] sm:$0xff]  ;;  %v71_v16 = vld [vmem:[#allocation2 + $0xe] sm:$0xff] }
  0x15   :  { %522 = vmatpush.bf16.msra.mxu0 %v973_v3  ;;  %v979_v13 = vld [vmem:[#allocation5 + $0x60] sm:$0xff]  ;;  %v69_v15 = vld [vmem:[#allocation2] sm:$0xff]  ;;  %v75_v18 = vld [vmem:[#allocation2 + $0x2a] sm:$0xff]  ;;  %87 = vst [vmem:[#allocation1 + $0x1] ss:$4 sm:$0xff] %v71_v16 }
  0x16   :  { %535 = vmatpush.bf16.msra.mxu1 %v981_v4  ;;  %v987_v14 = vld [vmem:[#allocation5 + $0xa0] sm:$0xff]  ;;  %85 = vst [vmem:[#allocation1] ss:$4 sm:$0xff] %v69_v15  ;;  %v970_v20 = vld [vmem:[#allocation5 + $0x18] sm:$0xff]  ;;  %v969_v23 = vld [vmem:[#allocation5 + $0x10] sm:$0xff] }
  0x17   :  { %548 = vmatpush.bf16.msra.mxu2 %v989_v5  ;;  %v73_v17 = vld [vmem:[#allocation2 + $0x1c] sm:$0xff]  ;;  %v978_v21 = vld [vmem:[#allocation5 + $0x58] sm:$0xff]  ;;  %91 = vst [vmem:[#allocation1 + $0x3] ss:$4 sm:$0xff] %v75_v18  ;;  %v70_v24 = vld [vmem:[#allocation2 + $0x8] sm:$0x3f] }
  0x18   :  { %561 = vmatpush.bf16.msra.mxu3 %v997_v7  ;;  %v995_v19 = vld [vmem:[#allocation5 + $0xe0] sm:$0xff]  ;;  %89 = vst [vmem:[#allocation1 + $0x2] ss:$4 sm:$0xff] %v73_v17  ;;  %v986_v22 = vld [vmem:[#allocation5 + $0x98] sm:$0xff]  ;;  %v74_v26 = vld [vmem:[#allocation2 + $0x24] sm:$0x3f] }
  0x19   :  { %523 = vmatpush.bf16.msra.mxu0 %v972_v8  ;;  %v72_v25 = vld [vmem:[#allocation2 + $0x16] sm:$0x3f]  ;;  %v977_v27 = vld [vmem:[#allocation5 + $0x50] sm:$0xff]  ;;  %93 = vst [vmem:[#allocation1 + $0x20] ss:$4 sm:$0xff] %v70_v24  ;;  %v968_v32 = vld [vmem:[#allocation5 + $0x8] sm:$0xff] }
  0x1a   :  { %536 = vmatpush.bf16.msra.mxu1 %v980_v9  ;;  %v994_v28 = vld [vmem:[#allocation5 + $0xd8] sm:$0xff]  ;;  %95 = vst [vmem:[#allocation1 + $0x21] ss:$4 sm:$0xff] %v72_v25  ;;  %v985_v30 = vld [vmem:[#allocation5 + $0x90] sm:$0xff]  ;;  %v976_v33 = vld [vmem:[#allocation5 + $0x48] sm:$0xff] }
  0x1b   :  { %549 = vmatpush.bf16.msra.mxu2 %v988_v10  ;;  %v76_v29 = vld [vmem:[#allocation2 + $0x32] sm:$0x3f]  ;;  %97 = vst [vmem:[#allocation1 + $0x22] ss:$4 sm:$0xff] %v74_v26  ;;  %v993_v31 = vld [vmem:[#allocation5 + $0xd0] sm:$0xff]  ;;  %v984_v34 = vld [vmem:[#allocation5 + $0x88] sm:$0xff] }
  0x1c   :  { %562 = vmatpush.bf16.msra.mxu3 %v996_v11  ;;  %99 = vst [vmem:[#allocation1 + $0x23] ss:$4 sm:$0xff] %v76_v29  ;;  %v967_v35 = vld [vmem:[#allocation5] sm:$0xff]  ;;  %v992_v37 = vld [vmem:[#allocation5 + $0xc8] sm:$0xff]  ;;  %v1006_v40 = vld [vmem:[#allocation5 + $0x138] sm:$0xff] }
  0x1d   :  { %524 = vmatpush.bf16.msra.mxu0 %v971_v12  ;;  %v975_v36 = vld [vmem:[#allocation5 + $0x40] sm:$0xff]  ;;  %v1014_v41 = vld [vmem:[#allocation5 + $0x178] sm:$0xff]  ;;  %v1005_v49 = vld [vmem:[#allocation5 + $0x130] sm:$0xff] }
  0x1e   :  { %537 = vmatpush.bf16.msra.mxu1 %v979_v13  ;;  %v983_v42 = vld [vmem:[#allocation5 + $0x80] sm:$0xff]  ;;  %v1013_v50 = vld [vmem:[#allocation5 + $0x170] sm:$0xff]  ;;  %v1004_v53 = vld [vmem:[#allocation5 + $0x128] sm:$0xff] }
  0x1f   :  { %550 = vmatpush.bf16.msra.mxu2 %v987_v14  ;;  %v100_v38 = vld.sshfl [vmem:[#allocation1] sm:$0xff pattern:$0x73625140]  ;;  %v101_v39 = vld.sshfl [vmem:[#allocation1 + $0x8] sm:$0xff pattern:$0x73625140] }
  0x20   :  { %563 = vmatpush.bf16.msra.mxu3 %v995_v19  ;;  %v102_v43 = vld.sshfl [vmem:[#allocation1 + $0x10] sm:$0xff pattern:$0x73625140]  ;;  %v114_v44 = vpack.c.bf16 %v100_v38, %v100_v38  ;;  %v115_v45 = vpack.c.bf16 %v101_v39, %v101_v39  ;;  %v991_v46 = vld [vmem:[#allocation5 + $0xc0] sm:$0xff]  ;;  %v1012_v54 = vld [vmem:[#allocation5 + $0x168] sm:$0xff] }
  0x21   :  { %525 = vmatpush.bf16.msra.mxu0 %v970_v20  ;;  %v1015_v47 = vld [vmem:[#allocation5 + $0x180] sm:$0xff]  ;;  %v103_v48 = vld.sshfl [vmem:[#allocation1 + $0x18] sm:$0xff pattern:$0x73625140]  ;;  %v116_v51 = vpack.c.bf16 %v102_v43, %v102_v43  ;;  %v1001_v60 = vld [vmem:[#allocation5 + $0x110] sm:$0xff] }
  0x22   :  { %538 = vmatpush.bf16.msra.mxu1 %v978_v21  ;;  %v117_v52 = vpack.c.bf16 %v103_v48, %v103_v48  ;;  %v1003_v55 = vld [vmem:[#allocation5 + $0x120] sm:$0xff]  ;;  %v1002_v57 = vld [vmem:[#allocation5 + $0x118] sm:$0xff]  ;;  %v1009_v61 = vld [vmem:[#allocation5 + $0x150] sm:$0xff] }
  0x23   :  { %551 = vmatpush.bf16.msra.mxu2 %v986_v22  ;;  %v1011_v56 = vld [vmem:[#allocation5 + $0x160] sm:$0xff]  ;;  %v1010_v58 = vld [vmem:[#allocation5 + $0x158] sm:$0xff]  ;;  %v106_v59 = vld.sshfl [vmem:[#allocation1 + $0x30] sm:$0xff pattern:$0x73625140] }
  0x24   :  { %564 = vmatpush.bf16.msra.mxu3 %v994_v28  ;;  %v120_v62 = vpack.c.bf16 %v106_v59, %v106_v59  ;;  %v1000_v63 = vld [vmem:[#allocation5 + $0x108] sm:$0xff]  ;;  %v999_v1 = vld [vmem:[#allocation5 + $0x100] sm:$0xff]  ;;  %v1022_v8 = vld [vmem:[#allocation7 + $0x30] sm:$0xff] }
  0x25   :  { %526 = vmatpush.bf16.msra.mxu0 %v969_v23  ;;  %v1008_v0 = vld [vmem:[#allocation5 + $0x148] sm:$0xff]  ;;  %v1007_v2 = vld [vmem:[#allocation5 + $0x140] sm:$0xff]  ;;  %v1021_v9 = vld [vmem:[#allocation7 + $0x28] sm:$0xff] }
  0x26   :  { %539 = vmatpush.bf16.msra.mxu1 %v977_v27  ;;  %v104_v3 = vld.sshfl [vmem:[#allocation1 + $0x20] sm:$0xff pattern:$0x73625140]  ;;  %v105_v4 = vld.sshfl [vmem:[#allocation1 + $0x28] sm:$0xff pattern:$0x73625140] }
  0x27   :  { %552 = vmatpush.bf16.msra.mxu2 %v985_v30  ;;  %v118_v5 = vpack.c.bf16 %v104_v3, %v104_v3  ;;  %v119_v6 = vpack.c.bf16 %v105_v4, %v105_v4  ;;  %v1023_v7 = vld [vmem:[#allocation7 + $0x38] sm:$0xff]  ;;  %v1020_v10 = vld [vmem:[#allocation7 + $0x20] sm:$0xff]  ;;  %v1018_v12 = vld [vmem:[#allocation7 + $0x10] sm:$0xff] }
  0x28   :  { %565 = vmatpush.bf16.msra.mxu3 %v993_v31  ;;  %v1019_v11 = vld [vmem:[#allocation7 + $0x18] sm:$0xff]  ;;  %v1017_v13 = vld [vmem:[#allocation7 + $0x8] sm:$0xff]  ;;  %v1016_v16 = vld [vmem:[#allocation7] sm:$0xff] }
  0x29   :  { %527 = vmatpush.bf16.msra.mxu0 %v968_v32  ;;  %v1034_v21 = vld [vmem:[%s1202_s2] ss:$0 sm:$0xff] }
  0x2a   :  { %540 = vmatpush.bf16.msra.mxu1 %v976_v33  ;;  %v1035_v39 = vld [vmem:[%s1204_s4] ss:$0 sm:$0xff] }
  0x2b   :  { %553 = vmatpush.bf16.msra.mxu2 %v984_v34 }
  0x2c   :  { %566 = vmatpush.bf16.msra.mxu3 %v992_v37 }
  0x2d   :  { %528 = vmatpush.bf16.msra.mxu0 %v967_v35 }
  0x2e   :  { %541 = vmatpush.bf16.msra.mxu1 %v975_v36 }
  0x2f   :  { %554 = vmatpush.bf16.msra.mxu2 %v983_v42 }
  0x30   :  { %529 = vmatmul.bf16.vlgmr.msra.gmra.mxu0 %v114_v44  ;;  %567 = vmatpush.bf16.msra.mxu3 %v991_v46 }
  0x31   :  { %573 = vmatpush.bf16.msrb.mxu0 %v1006_v40  ;;  %542 = vmatmul.bf16.vlgmr.msra.gmra.mxu1 %v115_v45 }
  0x32   :  { %586 = vmatpush.bf16.msrb.mxu1 %v1014_v41  ;;  %555 = vmatmul.bf16.vlgmr.msra.gmra.mxu2 %v116_v51 }
  0x33   :  { %606 = vmatpush.bf16.msrb.mxu2 %v1015_v47  ;;  %568 = vmatmul.bf16.vlgmr.msra.gmra.mxu3 %v117_v52 }
  0x34   :  { %682 = vmatpush.bf16.msrb.mxu3 %v1023_v7 }
  0x35   :  { %574 = vmatpush.bf16.msrb.mxu0 %v1005_v49 }
  0x36   :  { %587 = vmatpush.bf16.msrb.mxu1 %v1013_v50 }
  0x38   :  { %683 = vmatpush.bf16.msrb.mxu3 %v1022_v8 }
  0x39   :  { %575 = vmatpush.bf16.msrb.mxu0 %v1004_v53 }
  0x3a   :  { %588 = vmatpush.bf16.msrb.mxu1 %v1012_v54 }
  0x3c   :  { %684 = vmatpush.bf16.msrb.mxu3 %v1021_v9 }
  0x3d   :  { %576 = vmatpush.bf16.msrb.mxu0 %v1003_v55 }
  0x3e   :  { %589 = vmatpush.bf16.msrb.mxu1 %v1011_v56 }
  0x40   :  { %685 = vmatpush.bf16.msrb.mxu3 %v1020_v10 }
  0x41   :  { %577 = vmatpush.bf16.msrb.mxu0 %v1002_v57 }
  0x42   :  { %590 = vmatpush.bf16.msrb.mxu1 %v1010_v58  ;;  %934 = vmatmul.msk.bf16.vlgmr.msrb.gmra.mxu2 %vm517_vm0, %v120_v62 }
  0x44   :  { %686 = vmatpush.bf16.msrb.mxu3 %v1019_v11 }
  0x45   :  { %578 = vmatpush.bf16.msrb.mxu0 %v1001_v60 }
  0x46   :  { %591 = vmatpush.bf16.msrb.mxu1 %v1009_v61 }
  0x48   :  { %687 = vmatpush.bf16.msrb.mxu3 %v1018_v12 }
  0x49   :  { %579 = vmatpush.bf16.msrb.mxu0 %v1000_v63 }
  0x4a   :  { %592 = vmatpush.bf16.msrb.mxu1 %v1008_v0 }
  0x4c   :  { %688 = vmatpush.bf16.msrb.mxu3 %v1017_v13 }
  0x4d   :  { %580 = vmatpush.bf16.msrb.mxu0 %v999_v1 }
  0x4e   :  { %593 = vmatpush.bf16.msrb.mxu1 %v1007_v2 }
  0x50   :  { %581 = vmatmul.bf16.vlgmr.msrb.gmra.mxu0 %v118_v5  ;;  %689 = vmatpush.bf16.msrb.mxu3 %v1016_v16 }
  0x51   :  { %594 = vmatmul.bf16.vlgmr.msrb.gmra.mxu1 %v119_v6 }
  0xad   :  { %v530_v14 = vpop.f32.mrf.mxu0 }
  0xae   :  { %v543_v15 = vpop.f32.mrf.mxu1  ;;  %v531_v22 = vadd.f32 %v1034_v21, %v530_v14 }
  0xb0   :  { %v544_v25 = vadd.f32 %v543_v15, %v531_v22 }
  0xb5   :  { %v532_v17 = vpop.f32.mrf.mxu0  ;;  %v556_v19 = vpop.f32.mrf.mxu2 }
  0xb6   :  { %v545_v18 = vpop.f32.mrf.mxu1  ;;  %v569_v20 = vpop.f32.mrf.mxu3  ;;  %v557_v26 = vadd.f32 %v556_v19, %v544_v25 }
  0xb8   :  { %v570_v28 = vadd.f32 %v569_v20, %v557_v26 }
  0xbd   :  { %v558_v23 = vpop.f32.mrf.mxu2 }
  0xbe   :  { %v571_v24 = vpop.f32.mrf.mxu3 }
  0xc5   :  { %v608_v27 = vpop.f32.mrf.mxu2 }
  0xcd   :  { %v582_v29 = vpop.f32.mrf.mxu0  ;;  %v610_v33 = vpop.f32.mrf.mxu2 }
  0xce   :  { %v595_v30 = vpop.f32.mrf.mxu1  ;;  %v583_v31 = vadd.f32 %v582_v29, %v570_v28 }
  0xd0   :  { %v596_v32 = vadd.f32 %v595_v30, %v583_v31 }
  0xd2   :  { %v609_v34 = vadd.f32 %v608_v27, %v596_v32 }
  0xd4   :  { %v612_v35 = vmax.f32 %v609_v34, 0.0 }
  0xd5   :  { %v584_v36 = vpop.f32.mrf.mxu0 }
  0xd6   :  { %v597_v37 = vpop.f32.mrf.mxu1  ;;  %v613_v38 = vpack.c.bf16 %v612_v35, %v612_v35 }
  0xd8   :  { %690 = vmatmul.bf16.vlgmr.msrb.gmra.mxu3 %v613_v38 }
 0x15b   :  { %v691_v40 = vpop.f32.mrf.mxu3 }
 0x15c   :  { %v692_v41 = vadd.f32 %v1035_v39, %v691_v40 }
 0x15e   :  { %695 = vmax.xlane.f32.xlu0 %v692_v41 }
 0x163   :  { %v693_v42 = vpop.f32.mrf.mxu3 }
 0x1d1   :  { %v696_v43 = vpop.xlane.xlu0 %695 }
 0x1d2   :  { %v697_v44 = vsub.f32 %v692_v41, %v696_v43 }
 0x1d4   :  { %v698_v45 = vmul.f32 1.442695, %v697_v44 }
 0x1d6   :  { %1036 = vpow2.f32 %v698_v45 }
 0x1dc   :  { %v1037_v46 = vpop.eup %1036 }
 0x1dd   :  { %700 = vadd.xlane.f32.xlu0 %v1037_v46 }
 0x250   :  { %v701_v47 = vpop.xlane.xlu0 %700 }
 0x251   :  { %1038 = vrcp.f32 %v701_v47  ;;  %v713_v51 = vand.u32 2147483648, %v701_v47  ;;  %v711_v53 = vand.u32 2147483647, %v701_v47  ;;  %vm707_vm2 = vweird.f32 %v701_v47 }
 0x253   :  { %v714_v55 = vor.u32 1.1754944e-38, %v713_v51  ;;  %vm712_vm4 = vcmp.eq.f32.partialorder %v711_v53, 8.507059e+37 }
 0x257   :  { %v1039_v48 = vpop.eup %1038 }
 0x258   :  { %v703_v49 = vmul.f32 %v1039_v48, %v701_v47  ;;  %vm708_vm1 = vweird.f32 %v1039_v48 }
 0x259   :  { %vm709_vm3 = vmor %vm707_vm2, %vm708_vm1 }
 0x25a   :  { %v704_v50 = vsub.f32 1.0, %v703_v49 }
 0x25c   :  { %v705_v52 = vmul.f32 %v1039_v48, %v704_v50 }
 0x25e   :  { %v706_v54 = vadd.f32 %v1039_v48, %v705_v52 }
 0x260   :  { %v710_v56 = vsel %vm709_vm3, %v1039_v48, %v706_v54 }
 0x261   :  { %v715_v57 = vsel %vm712_vm4, %v714_v55, %v710_v56 }
 0x262   :  { %v716_v58 = vmul.f32 %v1037_v46, %v715_v57 }
 0x264   :  { %717 = vst [vmem:[#allocation8] sm:$0xff] %v716_v58 }
 0x265   :  { %721 = vsyncadd [#allocation4], 96  ;;  %s724_s13 = sshll.u32 %s1205_s5, 4  ;;  %s1149_s14 = smov [#allocation8]   ;;  %s725_s13 = int_to_ptr.hbm [resolvable:$true] %s724_s13 }
 0x266   :  { %s722_s15 = sshll.u32 %s1149_s14, 4  ;;  %s1150_s16 = smov 32   ;;  %s723_s15 = int_to_ptr.vmem [resolvable:$true] %s722_s15 }
 0x267   :  { %s1151_s17 = smov 2  }
 0x268   :  { %730 = dma.vmem_to_hbm [thread:$0]  %s723_s15, 32, %s725_s13, [#allocation4], %s1150_s16, %s1150_s16, %s1151_s17  }
 0x269   :  { %1140 = dma.done.wait [#allocation4], 128  }
 0x26a   :  { %1141 = vsyncadd [#allocation4], 4294967168 }
 0x26b   :  { %735 = vsyncpa [#allocation3], 1 }
 0x26c   :  { %736 = vsyncpa [#allocation6], 1 }
 0x26d   :  { %737 = vsyncpa [#allocation4], 1 }

</bundles_post_ra>
